<compile_context>
chip_gen: v6e
topology: v6e:2x2x1
jax: 0.10.0
libtpu: 0.0.40
codegen_flags: <defaults>
</compile_context>

<pallas_src>
import functools
import math

import jax
import jax.numpy as jnp
from jax import lax
from jax.experimental import pallas as pl
from jax.experimental.pallas import tpu as pltpu


# ---------------------------------------------------------------------------
# Kernel 1: fused  pre-LayerNorm -> multi-head attention -> residual add
# ---------------------------------------------------------------------------
def attn_residual_kernel(*refs, n_heads, eps, cross):
    if cross:
        (ab_ref, x_ref, kv_ref, mask_ref,
         wq_ref, wk_ref, wv_ref, wo_ref, b_ref, o_ref) = refs
    else:
        (ab_ref, x_ref, mask_ref,
         wq_ref, wk_ref, wv_ref, wo_ref, b_ref, o_ref) = refs

    alpha = ab_ref[0]                      # SMEM scalars (LN parameters)
    beta = ab_ref[1]

    x = x_ref[0].astype(jnp.float32)       # (S_q, D)

    def layer_norm(t):
        d = t.shape[-1]
        mean = jnp.mean(t, axis=-1, keepdims=True)
        diff = t - mean
        var = jnp.sum(diff * diff, axis=-1, keepdims=True) / (d - 1)  # ddof=1
        # One per-row reciprocal + multiply instead of a full-width divide.
        inv = alpha / (jnp.sqrt(var) + eps)
        return diff * inv + beta

    xn = layer_norm(x)
    if cross:
        # Cross-attention: K/V come from the *raw* encoder output (the
        # ResidualConnection only normalizes its own input x).
        kvn = kv_ref[0].astype(jnp.float32)          # (S_kv, D)
    else:
        # Self-attention: q = k = v = LN(x); reuse xn, no second LN / DMA.
        kvn = xn

    def project(t, w_ref, brow):
        # bf16 operands on the MXU, f32 accumulation.
        return (jnp.dot(t.astype(jnp.bfloat16), w_ref[...],
                        preferred_element_type=jnp.float32)
                + b_ref[brow:brow + 1, :])

    q = project(xn, wq_ref, 0)              # (S_q,  D)
    k = project(kvn, wk_ref, 1)             # (S_kv, D)
    v = project(kvn, wv_ref, 2)             # (S_kv, D)

    mask = mask_ref[...]                    # (S_q, S_kv): 1 = keep, 0 = mask
    d_k = q.shape[-1] // n_heads
    scale = 1.0 / math.sqrt(d_k)

    heads = []
    for h in range(n_heads):                # static loop, small n_heads
        lo = h * d_k
        qh = q[:, lo:lo + d_k]
        kh = k[:, lo:lo + d_k]
        vh = v[:, lo:lo + d_k]
        # scores = qh @ kh^T / sqrt(d_k)  (activation-activation matmul in f32)
        s = lax.dot_general(qh, kh, (((1,), (1,)), ((), ())),
                            preferred_element_type=jnp.float32) * scale
        s = jnp.where(mask == 0.0, -1e9, s)
        s = s - jnp.max(s, axis=-1, keepdims=True)
        p = jnp.exp(s)
        p = p * (1.0 / jnp.sum(p, axis=-1, keepdims=True))
        heads.append(jnp.dot(p, vh, preferred_element_type=jnp.float32))

    concat = jnp.concatenate(heads, axis=-1)              # (S_q, D)
    attn_out = (jnp.dot(concat.astype(jnp.bfloat16), wo_ref[...],
                        preferred_element_type=jnp.float32)
                + b_ref[3:4, :])
    # eval-mode dropout on the residual branch == identity
    o_ref[0] = (x + attn_out).astype(o_ref.dtype)


def attention_residual(x, kv, mask, wq, wk, wv, wo, biases4, alpha_beta,
                       *, n_heads, eps=1e-6, cross):
    """x: (B,Sq,D) queries/residual.  kv: (B,Skv,D) K/V source (cross only)."""
    B, Sq, D = x.shape
    kernel = functools.partial(attn_residual_kernel, n_heads=n_heads,
                               eps=eps, cross=cross)

    in_specs = [
        pl.BlockSpec(memory_space=pltpu.MemorySpace.SMEM),   # alpha/beta
        pl.BlockSpec((1, Sq, D), lambda b: (b, 0, 0)),       # x (residual / q)
    ]
    args = [alpha_beta, x]
    if cross:
        Skv = kv.shape[1]
        in_specs.append(pl.BlockSpec((1, Skv, D), lambda b: (b, 0, 0)))
        args.append(kv)
    else:
        Skv = Sq
    in_specs += [
        pl.BlockSpec((Sq, Skv), lambda b: (0, 0)),           # mask (resident)
        pl.BlockSpec((D, D), lambda b: (0, 0)),              # Wq (resident)
        pl.BlockSpec((D, D), lambda b: (0, 0)),              # Wk
        pl.BlockSpec((D, D), lambda b: (0, 0)),              # Wv
        pl.BlockSpec((D, D), lambda b: (0, 0)),              # Wo
        pl.BlockSpec((4, D), lambda b: (0, 0)),              # [bq;bk;bv;bo]
    ]
    args += [mask, wq, wk, wv, wo, biases4]

    return pl.pallas_call(
        kernel,
        out_shape=jax.ShapeDtypeStruct((B, Sq, D), x.dtype),
        grid=(B,),
        in_specs=in_specs,
        out_specs=pl.BlockSpec((1, Sq, D), lambda b: (b, 0, 0)),
        compiler_params=pltpu.CompilerParams(
            dimension_semantics=("parallel",)),
    )(*args)


# ---------------------------------------------------------------------------
# Kernel 2: fused  pre-LayerNorm -> FeedForward (Linear/ReLU/Linear) -> residual
# ---------------------------------------------------------------------------
def ffn_residual_kernel(ab_ref, x_ref, w1_ref, b1_ref, w2_ref, b2_ref, o_ref,
                        *, eps):
    alpha = ab_ref[0]
    beta = ab_ref[1]

    x = x_ref[...].astype(jnp.float32)      # (tm, D)
    d = x.shape[-1]
    mean = jnp.mean(x, axis=-1, keepdims=True)
    diff = x - mean
    var = jnp.sum(diff * diff, axis=-1, keepdims=True) / (d - 1)     # ddof=1
    inv = alpha / (jnp.sqrt(var) + eps)     # per-row reciprocal, then multiply
    xn = diff * inv + beta

    h = (jnp.dot(xn.astype(jnp.bfloat16), w1_ref[...],
                 preferred_element_type=jnp.float32) + b1_ref[...])
    h = jnp.maximum(h, 0.0)                 # ReLU; eval-mode dropout == identity
    y = (jnp.dot(h.astype(jnp.bfloat16), w2_ref[...],
                 preferred_element_type=jnp.float32) + b2_ref[...])
    o_ref[...] = (x + y).astype(o_ref.dtype)


def _pick_row_tile(n_rows, widest_dim, dtype_bytes=4, per_buffer_bytes=2 << 20):
    """Largest row tile that divides n_rows and keeps each (tile x widest_dim)
    activation buffer around 2 MiB, so that even on v7x (64 MiB VMEM) the
    double-buffered x/out tiles + resident bf16 weights fit with slack."""
    max_rows = max(8, per_buffer_bytes // (dtype_bytes * widest_dim))
    for cand in (1024, 512, 256, 128, 64, 32, 16, 8):
        if cand <= max_rows and n_rows % cand == 0:
            return cand
    return n_rows                            # full extent (always legal)


def ffn_residual(x2d, w1, b1, w2, b2, alpha_beta, *, eps=1e-6):
    """x2d: (N, D) flattened tokens.  w1: (D, H) bf16, w2: (H, D) bf16."""
    N, D = x2d.shape
    H = w1.shape[1]
    tm = _pick_row_tile(N, max(D, H))
    kernel = functools.partial(ffn_residual_kernel, eps=eps)
    return pl.pallas_call(
        kernel,
        out_shape=jax.ShapeDtypeStruct((N, D), x2d.dtype),
        grid=(N // tm,),
        in_specs=[
            pl.BlockSpec(memory_space=pltpu.MemorySpace.SMEM),   # alpha/beta
            pl.BlockSpec((tm, D), lambda i: (i, 0)),             # x row tile
            pl.BlockSpec((D, H), lambda i: (0, 0)),              # W1 (resident)
            pl.BlockSpec((1, H), lambda i: (0, 0)),              # b1
            pl.BlockSpec((H, D), lambda i: (0, 0)),              # W2 (resident)
            pl.BlockSpec((1, D), lambda i: (0, 0)),              # b2
        ],
        out_specs=pl.BlockSpec((tm, D), lambda i: (i, 0)),
        compiler_params=pltpu.CompilerParams(
            dimension_semantics=("parallel",)),
    )(alpha_beta, x2d, w1, b1, w2, b2)


# ---------------------------------------------------------------------------
# DecoderBlock forward = 3 fused residual kernels
# ---------------------------------------------------------------------------
def decoder_block(x, enc, src_mask, tgt_mask, self_p, cross_p, ffn_p,
                  alpha_beta, *, n_heads, eps=1e-6):
    B, S, D = x.shape
    wq1, wk1, wv1, wo1, b_self = self_p
    wq2, wk2, wv2, wo2, b_cross = cross_p
    w1, b1, w2, b2 = ffn_p
    # residual 0: self-attention, q = k = v = LN(x)
    x = attention_residual(x, None, tgt_mask, wq1, wk1, wv1, wo1, b_self,
                           alpha_beta, n_heads=n_heads, eps=eps, cross=False)
    # residual 1: cross-attention, k = v = raw encoder output (no LN)
    x = attention_residual(x, enc, src_mask, wq2, wk2, wv2, wo2, b_cross,
                           alpha_beta, n_heads=n_heads, eps=eps, cross=True)
    # residual 2: feed-forward over flattened tokens (large row tiles)
    y = ffn_residual(x.reshape(B * S, D), w1, b1, w2, b2, alpha_beta, eps=eps)
    return y.reshape(B, S, D)


# ---------------------------------------------------------------------------
# Pure-JAX reference (PyTorch semantics).  mirror=True applies the same bf16
# casts at the MXU boundaries as the kernel, isolating kernel wiring errors.
# ---------------------------------------------------------------------------
def _mm(a, w, mirror):
    if mirror:
        a = a.astype(jnp.bfloat16).astype(jnp.float32)
    return a @ w.astype(jnp.float32)


def layer_norm_ref(x, alpha, beta, eps):
    mean = x.mean(axis=-1, keepdims=True)
    std = jnp.std(x, axis=-1, keepdims=True, ddof=1)
    return alpha * (x - mean) / (std + eps) + beta


def mha_ref(q_in, kv_in, mask, wq, wk, wv, wo, b4, n_heads, mirror):
    B, Sq, D = q_in.shape
    d_k = D // n_heads

    def split(t):
        return t.reshape(t.shape[0], t.shape[1], n_heads, d_k).transpose(0, 2, 1, 3)

    q = split(_mm(q_in, wq, mirror) + b4[0:1])
    k = split(_mm(kv_in, wk, mirror) + b4[1:2])
    v = split(_mm(kv_in, wv, mirror) + b4[2:3])
    s = jnp.einsum("bhqd,bhkd->bhqk", q, k) / math.sqrt(d_k)
    s = jnp.where(mask == 0.0, -1e9, s)
    p = jax.nn.softmax(s, axis=-1)
    o = jnp.einsum("bhqk,bhkd->bhqd", p, v)
    o = o.transpose(0, 2, 1, 3).reshape(B, Sq, D)
    return _mm(o, wo, mirror) + b4[3:4]


def ffn_ref(x, w1, b1, w2, b2, mirror):
    h = jnp.maximum(_mm(x, w1, mirror) + b1, 0.0)
    return _mm(h, w2, mirror) + b2


def decoder_block_ref(x, enc, src_mask, tgt_mask, self_p, cross_p, ffn_p,
                      alpha_beta, n_heads, eps, mirror):
    a, b = alpha_beta[0], alpha_beta[1]
    wq1, wk1, wv1, wo1, b_self = self_p
    wq2, wk2, wv2, wo2, b_cross = cross_p
    w1, b1, w2, b2 = ffn_p
    xn = layer_norm_ref(x, a, b, eps)
    x = x + mha_ref(xn, xn, tgt_mask, wq1, wk1, wv1, wo1, b_self, n_heads, mirror)
    xn = layer_norm_ref(x, a, b, eps)
    x = x + mha_ref(xn, enc, src_mask, wq2, wk2, wv2, wo2, b_cross, n_heads, mirror)
    xn = layer_norm_ref(x, a, b, eps)
    x = x + ffn_ref(xn, w1, b1, w2, b2, mirror)
    return x


# ---------------------------------------------------------------------------
if __name__ == "__main__":
    B, S_TGT, S_SRC = 2, 8, 8
    D, N_HEADS, D_FF = 32, 4, 128
    EPS = 1e-6

    key = jax.random.PRNGKey(0)
    keys = jax.random.split(key, 12)

    def linear(k, fan_in, fan_out):
        kw, kb = jax.random.split(k)
        w = (jax.random.normal(kw, (fan_in, fan_out), jnp.float32)
             / jnp.sqrt(fan_in)).astype(jnp.bfloat16)      # bf16 weights (MXU)
        b = 0.1 * jax.random.normal(kb, (1, fan_out), jnp.float32)
        return w, b

    wq1, bq1 = linear(keys[0], D, D); wk1, bk1 = linear(keys[1], D, D)
    wv1, bv1 = linear(keys[2], D, D); wo1, bo1 = linear(keys[3], D, D)
    wq2, bq2 = linear(keys[4], D, D); wk2, bk2 = linear(keys[5], D, D)
    wv2, bv2 = linear(keys[6], D, D); wo2, bo2 = linear(keys[7], D, D)
    w1, b1 = linear(keys[8], D, D_FF)
    w2, b2 = linear(keys[9], D_FF, D)

    self_p = (wq1, wk1, wv1, wo1, jnp.concatenate([bq1, bk1, bv1, bo1], axis=0))
    cross_p = (wq2, wk2, wv2, wo2, jnp.concatenate([bq2, bk2, bv2, bo2], axis=0))
    ffn_p = (w1, b1, w2, b2)

    # ManualLayerNormalization parameters (alpha=1, bias=0), read from SMEM.
    alpha_beta = jnp.array([1.0, 0.0], jnp.float32)

    x = jax.random.normal(keys[10], (B, S_TGT, D), jnp.float32)
    enc = jax.random.normal(keys[11], (B, S_SRC, D), jnp.float32)
    tgt_mask = jnp.tril(jnp.ones((S_TGT, S_TGT), jnp.float32))   # causal
    src_mask = jnp.ones((S_TGT, S_SRC), jnp.float32)             # no masking

    out = decoder_block(x, enc, src_mask, tgt_mask, self_p, cross_p, ffn_p,
                        alpha_beta, n_heads=N_HEADS, eps=EPS)
    out = jax.block_until_ready(out)
    assert out.shape == (B, S_TGT, D)

    # Tight check: reference mirrors the kernel's bf16 MXU casts, so any
    # remaining difference is kernel wiring / accumulation-order only.
    ref_mirror = decoder_block_ref(x, enc, src_mask, tgt_mask, self_p, cross_p,
                                   ffn_p, alpha_beta, N_HEADS, EPS, mirror=True)
    assert jnp.allclose(out, ref_mirror, atol=2e-3, rtol=2e-3), \
        "kernel mismatch vs bf16-mirrored reference"

    # Loose check vs the pure-f32 PyTorch-semantics reference: bounds the drift
    # introduced by running the weight matmuls in bf16 (perf choice).
    ref_f32 = decoder_block_ref(x, enc, src_mask, tgt_mask, self_p, cross_p,
                                ffn_p, alpha_beta, N_HEADS, EPS, mirror=False)
    assert jnp.allclose(out, ref_f32, atol=5e-2, rtol=5e-2), \
        "bf16 drift vs f32 reference too large"

    print("KERNEL_OK")
</pallas_src>

<mosaic_0001>
module attributes {stable_mosaic.version = 11 : i64} {
  func.func @attn_residual_kernel(%arg0: i32, %arg1: memref<2xf32, #tpu.memory_space<smem>>, %arg2: memref<1x8x32xf32, #tpu.memory_space<vmem>>, %arg3: memref<8x8xf32, #tpu.memory_space<vmem>>, %arg4: memref<32x32xbf16, #tpu.memory_space<vmem>>, %arg5: memref<32x32xbf16, #tpu.memory_space<vmem>>, %arg6: memref<32x32xbf16, #tpu.memory_space<vmem>>, %arg7: memref<32x32xbf16, #tpu.memory_space<vmem>>, %arg8: memref<4x32xf32, #tpu.memory_space<vmem>>, %arg9: memref<1x8x32xf32, #tpu.memory_space<vmem>>) attributes {dimension_semantics = [#tpu.dimension_semantics<parallel>], iteration_bounds = array<i64: 2>, scalar_prefetch = 0 : i64, scratch_operands = 0 : i64, tpu.core_type = #tpu.core_type<tc>, window_params = [{transform_indices = @transform_0, window_bounds = array<i64: 2>}, {transform_indices = @transform_1, window_bounds = array<i64: 1, 8, 32>}, {pipeline_mode = #tpu.pipeline_mode<synchronous>, transform_indices = @transform_2, window_bounds = array<i64: 8, 8>}, {pipeline_mode = #tpu.pipeline_mode<synchronous>, transform_indices = @transform_3, window_bounds = array<i64: 32, 32>}, {pipeline_mode = #tpu.pipeline_mode<synchronous>, transform_indices = @transform_4, window_bounds = array<i64: 32, 32>}, {pipeline_mode = #tpu.pipeline_mode<synchronous>, transform_indices = @transform_5, window_bounds = array<i64: 32, 32>}, {pipeline_mode = #tpu.pipeline_mode<synchronous>, transform_indices = @transform_6, window_bounds = array<i64: 32, 32>}, {pipeline_mode = #tpu.pipeline_mode<synchronous>, transform_indices = @transform_7, window_bounds = array<i64: 4, 32>}, {transform_indices = @transform_8, window_bounds = array<i64: 1, 8, 32>}]} {
    %c0 = arith.constant 0 : index
    %0 = memref.load %arg1[%c0] : memref<2xf32, #tpu.memory_space<smem>>
    %c1 = arith.constant 1 : index
    %1 = memref.load %arg1[%c1] : memref<2xf32, #tpu.memory_space<smem>>
    %c0_0 = arith.constant 0 : index
    %c0_1 = arith.constant 0 : index
    %c0_2 = arith.constant 0 : index
    %2 = vector.load %arg2[%c0_0, %c0_1, %c0_2] : memref<1x8x32xf32, #tpu.memory_space<vmem>>, vector<1x8x32xf32>
    %3 = vector.shape_cast %2 : vector<1x8x32xf32> to vector<8x32xf32>
    %cst = arith.constant dense<0.000000e+00> : vector<8xf32>
    %4 = vector.multi_reduction <add>, %3, %cst [1] : vector<8x32xf32> to vector<8xf32>
    %5 = vector.shape_cast %4 : vector<8xf32> to vector<8x1xf32>
    %cst_3 = arith.constant 3.200000e+01 : f32
    %6 = vector.broadcast %cst_3 : f32 to vector<8x1xf32>
    %7 = arith.divf %5, %6 : vector<8x1xf32>
    %8 = vector.broadcast %7 : vector<8x1xf32> to vector<8x32xf32>
    %9 = arith.subf %3, %8 : vector<8x32xf32>
    %10 = arith.mulf %9, %9 : vector<8x32xf32>
    %cst_4 = arith.constant dense<0.000000e+00> : vector<8xf32>
    %11 = vector.multi_reduction <add>, %10, %cst_4 [1] : vector<8x32xf32> to vector<8xf32>
    %12 = vector.shape_cast %11 : vector<8xf32> to vector<8x1xf32>
    %cst_5 = arith.constant 3.100000e+01 : f32
    %13 = vector.broadcast %cst_5 : f32 to vector<8x1xf32>
    %14 = arith.divf %12, %13 : vector<8x1xf32>
    %15 = math.sqrt %14 : vector<8x1xf32>
    %cst_6 = arith.constant 9.99999997E-7 : f32
    %16 = vector.broadcast %cst_6 : f32 to vector<8x1xf32>
    %17 = arith.addf %15, %16 : vector<8x1xf32>
    %18 = vector.broadcast %0 : f32 to vector<8x1xf32>
    %19 = arith.divf %18, %17 : vector<8x1xf32>
    %20 = vector.broadcast %19 : vector<8x1xf32> to vector<8x32xf32>
    %21 = arith.mulf %9, %20 : vector<8x32xf32>
    %22 = vector.broadcast %1 : f32 to vector<8x32xf32>
    %23 = arith.addf %21, %22 : vector<8x32xf32>
    %24 = arith.truncf %23 : vector<8x32xf32> to vector<8x32xbf16>
    %c0_7 = arith.constant 0 : index
    %c0_8 = arith.constant 0 : index
    %25 = vector.load %arg4[%c0_7, %c0_8] : memref<32x32xbf16, #tpu.memory_space<vmem>>, vector<32x32xbf16>
    %cst_9 = arith.constant dense<0.000000e+00> : vector<8x32xf32>
    %26 = tpu.matmul %24, %25, %cst_9 {dimension_numbers = #tpu.dot_dimension_numbers<[1], [0], [0], [1], [0, 0, 1, 1], [], []>} : vector<8x32xbf16>, vector<32x32xbf16>, vector<8x32xf32> -> vector<8x32xf32>
    %c0_10 = arith.constant 0 : index
    %c0_11 = arith.constant 0 : index
    %27 = vector.load %arg8[%c0_10, %c0_11] : memref<4x32xf32, #tpu.memory_space<vmem>>, vector<1x32xf32>
    %28 = vector.broadcast %27 : vector<1x32xf32> to vector<8x32xf32>
    %29 = arith.addf %26, %28 : vector<8x32xf32>
    %30 = arith.truncf %23 : vector<8x32xf32> to vector<8x32xbf16>
    %c0_12 = arith.constant 0 : index
    %c0_13 = arith.constant 0 : index
    %31 = vector.load %arg5[%c0_12, %c0_13] : memref<32x32xbf16, #tpu.memory_space<vmem>>, vector<32x32xbf16>
    %cst_14 = arith.constant dense<0.000000e+00> : vector<8x32xf32>
    %32 = tpu.matmul %30, %31, %cst_14 {dimension_numbers = #tpu.dot_dimension_numbers<[1], [0], [0], [1], [0, 0, 1, 1], [], []>} : vector<8x32xbf16>, vector<32x32xbf16>, vector<8x32xf32> -> vector<8x32xf32>
    %c1_15 = arith.constant 1 : index
    %c0_16 = arith.constant 0 : index
    %33 = vector.load %arg8[%c1_15, %c0_16] : memref<4x32xf32, #tpu.memory_space<vmem>>, vector<1x32xf32>
    %34 = vector.broadcast %33 : vector<1x32xf32> to vector<8x32xf32>
    %35 = arith.addf %32, %34 : vector<8x32xf32>
    %36 = arith.truncf %23 : vector<8x32xf32> to vector<8x32xbf16>
    %c0_17 = arith.constant 0 : index
    %c0_18 = arith.constant 0 : index
    %37 = vector.load %arg6[%c0_17, %c0_18] : memref<32x32xbf16, #tpu.memory_space<vmem>>, vector<32x32xbf16>
    %cst_19 = arith.constant dense<0.000000e+00> : vector<8x32xf32>
    %38 = tpu.matmul %36, %37, %cst_19 {dimension_numbers = #tpu.dot_dimension_numbers<[1], [0], [0], [1], [0, 0, 1, 1], [], []>} : vector<8x32xbf16>, vector<32x32xbf16>, vector<8x32xf32> -> vector<8x32xf32>
    %c2 = arith.constant 2 : index
    %c0_20 = arith.constant 0 : index
    %39 = vector.load %arg8[%c2, %c0_20] : memref<4x32xf32, #tpu.memory_space<vmem>>, vector<1x32xf32>
    %40 = vector.broadcast %39 : vector<1x32xf32> to vector<8x32xf32>
    %41 = arith.addf %38, %40 : vector<8x32xf32>
    %c0_21 = arith.constant 0 : index
    %c0_22 = arith.constant 0 : index
    %42 = vector.load %arg3[%c0_21, %c0_22] : memref<8x8xf32, #tpu.memory_space<vmem>>, vector<8x8xf32>
    %43 = vector.extract_strided_slice %29 {offsets = [0, 0], sizes = [8, 8], strides = [1, 1]} : vector<8x32xf32> to vector<8x8xf32>
    %44 = vector.extract_strided_slice %35 {offsets = [0, 0], sizes = [8, 8], strides = [1, 1]} : vector<8x32xf32> to vector<8x8xf32>
    %45 = vector.extract_strided_slice %41 {offsets = [0, 0], sizes = [8, 8], strides = [1, 1]} : vector<8x32xf32> to vector<8x8xf32>
    %cst_23 = arith.constant dense<0.000000e+00> : vector<8x8xf32>
    %46 = tpu.matmul %43, %44, %cst_23 {dimension_numbers = #tpu.dot_dimension_numbers<[1], [1], [0], [0], [0, 0, 1, 0], [], []>} : vector<8x8xf32>, vector<8x8xf32>, vector<8x8xf32> -> vector<8x8xf32>
    %cst_24 = arith.constant 0.353553385 : f32
    %47 = vector.broadcast %cst_24 : f32 to vector<8x8xf32>
    %48 = arith.mulf %46, %47 : vector<8x8xf32>
    %cst_25 = arith.constant 0.000000e+00 : f32
    %49 = vector.broadcast %cst_25 : f32 to vector<8x8xf32>
    %50 = arith.cmpf oeq, %42, %49 : vector<8x8xf32>
    %cst_26 = arith.constant -1.000000e+09 : f32
    %51 = vector.broadcast %cst_26 : f32 to vector<8x8xf32>
    %52 = arith.select %50, %51, %48 : vector<8x8xi1>, vector<8x8xf32>
    %cst_27 = arith.constant dense<0xFF800000> : vector<8xf32>
    %53 = vector.multi_reduction <maximumf>, %52, %cst_27 [1] : vector<8x8xf32> to vector<8xf32>
    %54 = vector.shape_cast %53 : vector<8xf32> to vector<8x1xf32>
    %55 = vector.broadcast %54 : vector<8x1xf32> to vector<8x8xf32>
    %56 = arith.subf %52, %55 : vector<8x8xf32>
    %57 = math.exp %56 : vector<8x8xf32>
    %cst_28 = arith.constant dense<0.000000e+00> : vector<8xf32>
    %58 = vector.multi_reduction <add>, %57, %cst_28 [1] : vector<8x8xf32> to vector<8xf32>
    %59 = vector.shape_cast %58 : vector<8xf32> to vector<8x1xf32>
    %cst_29 = arith.constant 1.000000e+00 : f32
    %60 = vector.broadcast %cst_29 : f32 to vector<8x1xf32>
    %61 = arith.divf %60, %59 : vector<8x1xf32>
    %62 = vector.broadcast %61 : vector<8x1xf32> to vector<8x8xf32>
    %63 = arith.mulf %57, %62 : vector<8x8xf32>
    %cst_30 = arith.constant dense<0.000000e+00> : vector<8x8xf32>
    %64 = tpu.matmul %63, %45, %cst_30 {dimension_numbers = #tpu.dot_dimension_numbers<[1], [0], [0], [1], [0, 0, 1, 1], [], []>} : vector<8x8xf32>, vector<8x8xf32>, vector<8x8xf32> -> vector<8x8xf32>
    %65 = vector.extract_strided_slice %29 {offsets = [0, 8], sizes = [8, 8], strides = [1, 1]} : vector<8x32xf32> to vector<8x8xf32>
    %66 = vector.extract_strided_slice %35 {offsets = [0, 8], sizes = [8, 8], strides = [1, 1]} : vector<8x32xf32> to vector<8x8xf32>
    %67 = vector.extract_strided_slice %41 {offsets = [0, 8], sizes = [8, 8], strides = [1, 1]} : vector<8x32xf32> to vector<8x8xf32>
    %cst_31 = arith.constant dense<0.000000e+00> : vector<8x8xf32>
    %68 = tpu.matmul %65, %66, %cst_31 {dimension_numbers = #tpu.dot_dimension_numbers<[1], [1], [0], [0], [0, 0, 1, 0], [], []>} : vector<8x8xf32>, vector<8x8xf32>, vector<8x8xf32> -> vector<8x8xf32>
    %cst_32 = arith.constant 0.353553385 : f32
    %69 = vector.broadcast %cst_32 : f32 to vector<8x8xf32>
    %70 = arith.mulf %68, %69 : vector<8x8xf32>
    %cst_33 = arith.constant 0.000000e+00 : f32
    %71 = vector.broadcast %cst_33 : f32 to vector<8x8xf32>
    %72 = arith.cmpf oeq, %42, %71 : vector<8x8xf32>
    %cst_34 = arith.constant -1.000000e+09 : f32
    %73 = vector.broadcast %cst_34 : f32 to vector<8x8xf32>
    %74 = arith.select %72, %73, %70 : vector<8x8xi1>, vector<8x8xf32>
    %cst_35 = arith.constant dense<0xFF800000> : vector<8xf32>
    %75 = vector.multi_reduction <maximumf>, %74, %cst_35 [1] : vector<8x8xf32> to vector<8xf32>
    %76 = vector.shape_cast %75 : vector<8xf32> to vector<8x1xf32>
    %77 = vector.broadcast %76 : vector<8x1xf32> to vector<8x8xf32>
    %78 = arith.subf %74, %77 : vector<8x8xf32>
    %79 = math.exp %78 : vector<8x8xf32>
    %cst_36 = arith.constant dense<0.000000e+00> : vector<8xf32>
    %80 = vector.multi_reduction <add>, %79, %cst_36 [1] : vector<8x8xf32> to vector<8xf32>
    %81 = vector.shape_cast %80 : vector<8xf32> to vector<8x1xf32>
    %cst_37 = arith.constant 1.000000e+00 : f32
    %82 = vector.broadcast %cst_37 : f32 to vector<8x1xf32>
    %83 = arith.divf %82, %81 : vector<8x1xf32>
    %84 = vector.broadcast %83 : vector<8x1xf32> to vector<8x8xf32>
    %85 = arith.mulf %79, %84 : vector<8x8xf32>
    %cst_38 = arith.constant dense<0.000000e+00> : vector<8x8xf32>
    %86 = tpu.matmul %85, %67, %cst_38 {dimension_numbers = #tpu.dot_dimension_numbers<[1], [0], [0], [1], [0, 0, 1, 1], [], []>} : vector<8x8xf32>, vector<8x8xf32>, vector<8x8xf32> -> vector<8x8xf32>
    %87 = vector.extract_strided_slice %29 {offsets = [0, 16], sizes = [8, 8], strides = [1, 1]} : vector<8x32xf32> to vector<8x8xf32>
    %88 = vector.extract_strided_slice %35 {offsets = [0, 16], sizes = [8, 8], strides = [1, 1]} : vector<8x32xf32> to vector<8x8xf32>
    %89 = vector.extract_strided_slice %41 {offsets = [0, 16], sizes = [8, 8], strides = [1, 1]} : vector<8x32xf32> to vector<8x8xf32>
    %cst_39 = arith.constant dense<0.000000e+00> : vector<8x8xf32>
    %90 = tpu.matmul %87, %88, %cst_39 {dimension_numbers = #tpu.dot_dimension_numbers<[1], [1], [0], [0], [0, 0, 1, 0], [], []>} : vector<8x8xf32>, vector<8x8xf32>, vector<8x8xf32> -> vector<8x8xf32>
    %cst_40 = arith.constant 0.353553385 : f32
    %91 = vector.broadcast %cst_40 : f32 to vector<8x8xf32>
    %92 = arith.mulf %90, %91 : vector<8x8xf32>
    %cst_41 = arith.constant 0.000000e+00 : f32
    %93 = vector.broadcast %cst_41 : f32 to vector<8x8xf32>
    %94 = arith.cmpf oeq, %42, %93 : vector<8x8xf32>
    %cst_42 = arith.constant -1.000000e+09 : f32
    %95 = vector.broadcast %cst_42 : f32 to vector<8x8xf32>
    %96 = arith.select %94, %95, %92 : vector<8x8xi1>, vector<8x8xf32>
    %cst_43 = arith.constant dense<0xFF800000> : vector<8xf32>
    %97 = vector.multi_reduction <maximumf>, %96, %cst_43 [1] : vector<8x8xf32> to vector<8xf32>
    %98 = vector.shape_cast %97 : vector<8xf32> to vector<8x1xf32>
    %99 = vector.broadcast %98 : vector<8x1xf32> to vector<8x8xf32>
    %100 = arith.subf %96, %99 : vector<8x8xf32>
    %101 = math.exp %100 : vector<8x8xf32>
    %cst_44 = arith.constant dense<0.000000e+00> : vector<8xf32>
    %102 = vector.multi_reduction <add>, %101, %cst_44 [1] : vector<8x8xf32> to vector<8xf32>
    %103 = vector.shape_cast %102 : vector<8xf32> to vector<8x1xf32>
    %cst_45 = arith.constant 1.000000e+00 : f32
    %104 = vector.broadcast %cst_45 : f32 to vector<8x1xf32>
    %105 = arith.divf %104, %103 : vector<8x1xf32>
    %106 = vector.broadcast %105 : vector<8x1xf32> to vector<8x8xf32>
    %107 = arith.mulf %101, %106 : vector<8x8xf32>
    %cst_46 = arith.constant dense<0.000000e+00> : vector<8x8xf32>
    %108 = tpu.matmul %107, %89, %cst_46 {dimension_numbers = #tpu.dot_dimension_numbers<[1], [0], [0], [1], [0, 0, 1, 1], [], []>} : vector<8x8xf32>, vector<8x8xf32>, vector<8x8xf32> -> vector<8x8xf32>
    %109 = vector.extract_strided_slice %29 {offsets = [0, 24], sizes = [8, 8], strides = [1, 1]} : vector<8x32xf32> to vector<8x8xf32>
    %110 = vector.extract_strided_slice %35 {offsets = [0, 24], sizes = [8, 8], strides = [1, 1]} : vector<8x32xf32> to vector<8x8xf32>
    %111 = vector.extract_strided_slice %41 {offsets = [0, 24], sizes = [8, 8], strides = [1, 1]} : vector<8x32xf32> to vector<8x8xf32>
    %cst_47 = arith.constant dense<0.000000e+00> : vector<8x8xf32>
    %112 = tpu.matmul %109, %110, %cst_47 {dimension_numbers = #tpu.dot_dimension_numbers<[1], [1], [0], [0], [0, 0, 1, 0], [], []>} : vector<8x8xf32>, vector<8x8xf32>, vector<8x8xf32> -> vector<8x8xf32>
    %cst_48 = arith.constant 0.353553385 : f32
    %113 = vector.broadcast %cst_48 : f32 to vector<8x8xf32>
    %114 = arith.mulf %112, %113 : vector<8x8xf32>
    %cst_49 = arith.constant 0.000000e+00 : f32
    %115 = vector.broadcast %cst_49 : f32 to vector<8x8xf32>
    %116 = arith.cmpf oeq, %42, %115 : vector<8x8xf32>
    %cst_50 = arith.constant -1.000000e+09 : f32
    %117 = vector.broadcast %cst_50 : f32 to vector<8x8xf32>
    %118 = arith.select %116, %117, %114 : vector<8x8xi1>, vector<8x8xf32>
    %cst_51 = arith.constant dense<0xFF800000> : vector<8xf32>
    %119 = vector.multi_reduction <maximumf>, %118, %cst_51 [1] : vector<8x8xf32> to vector<8xf32>
    %120 = vector.shape_cast %119 : vector<8xf32> to vector<8x1xf32>
    %121 = vector.broadcast %120 : vector<8x1xf32> to vector<8x8xf32>
    %122 = arith.subf %118, %121 : vector<8x8xf32>
    %123 = math.exp %122 : vector<8x8xf32>
    %cst_52 = arith.constant dense<0.000000e+00> : vector<8xf32>
    %124 = vector.multi_reduction <add>, %123, %cst_52 [1] : vector<8x8xf32> to vector<8xf32>
    %125 = vector.shape_cast %124 : vector<8xf32> to vector<8x1xf32>
    %cst_53 = arith.constant 1.000000e+00 : f32
    %126 = vector.broadcast %cst_53 : f32 to vector<8x1xf32>
    %127 = arith.divf %126, %125 : vector<8x1xf32>
    %128 = vector.broadcast %127 : vector<8x1xf32> to vector<8x8xf32>
    %129 = arith.mulf %123, %128 : vector<8x8xf32>
    %cst_54 = arith.constant dense<0.000000e+00> : vector<8x8xf32>
    %130 = tpu.matmul %129, %111, %cst_54 {dimension_numbers = #tpu.dot_dimension_numbers<[1], [0], [0], [1], [0, 0, 1, 1], [], []>} : vector<8x8xf32>, vector<8x8xf32>, vector<8x8xf32> -> vector<8x8xf32>
    %131 = tpu.concatenate %64, %86, %108, %130 in 1 : vector<8x8xf32>, vector<8x8xf32>, vector<8x8xf32>, vector<8x8xf32> -> vector<8x32xf32>
    %132 = arith.truncf %131 : vector<8x32xf32> to vector<8x32xbf16>
    %c0_55 = arith.constant 0 : index
    %c0_56 = arith.constant 0 : index
    %133 = vector.load %arg7[%c0_55, %c0_56] : memref<32x32xbf16, #tpu.memory_space<vmem>>, vector<32x32xbf16>
    %cst_57 = arith.constant dense<0.000000e+00> : vector<8x32xf32>
    %134 = tpu.matmul %132, %133, %cst_57 {dimension_numbers = #tpu.dot_dimension_numbers<[1], [0], [0], [1], [0, 0, 1, 1], [], []>} : vector<8x32xbf16>, vector<32x32xbf16>, vector<8x32xf32> -> vector<8x32xf32>
    %c3 = arith.constant 3 : index
    %c0_58 = arith.constant 0 : index
    %135 = vector.load %arg8[%c3, %c0_58] : memref<4x32xf32, #tpu.memory_space<vmem>>, vector<1x32xf32>
    %136 = vector.broadcast %135 : vector<1x32xf32> to vector<8x32xf32>
    %137 = arith.addf %134, %136 : vector<8x32xf32>
    %138 = arith.addf %3, %137 : vector<8x32xf32>
    %c0_59 = arith.constant 0 : index
    %c0_60 = arith.constant 0 : index
    %c0_61 = arith.constant 0 : index
    %139 = vector.load %arg9[%c0_59, %c0_60, %c0_61] : memref<1x8x32xf32, #tpu.memory_space<vmem>>, vector<1x8x32xf32>
    %140 = vector.shape_cast %139 : vector<1x8x32xf32> to vector<8x32xf32>
    %141 = vector.shape_cast %138 : vector<8x32xf32> to vector<1x8x32xf32>
    tpu.vector_store %arg9[%c0_59, %c0_60, %c0_61], %141 {strides = array<i32>} : memref<1x8x32xf32, #tpu.memory_space<vmem>>, vector<1x8x32xf32>,
    return
  }
  func.func @transform_0(%arg0: i32) -> i32 {
    %c0_i32 = arith.constant 0 : i32
    %c0_i32_0 = arith.constant 0 : i32
    return %c0_i32 : i32
  }
  func.func @transform_1(%arg0: i32) -> (i32, i32, i32) {
    %c0_i32 = arith.constant 0 : i32
    %c0_i32_0 = arith.constant 0 : i32
    %c0_i32_1 = arith.constant 0 : i32
    return %arg0, %c0_i32, %c0_i32_0 : i32, i32, i32
  }
  func.func @transform_2(%arg0: i32) -> (i32, i32) {
    %c0_i32 = arith.constant 0 : i32
    %c0_i32_0 = arith.constant 0 : i32
    %c0_i32_1 = arith.constant 0 : i32
    return %c0_i32, %c0_i32_0 : i32, i32
  }
  func.func @transform_3(%arg0: i32) -> (i32, i32) {
    %c0_i32 = arith.constant 0 : i32
    %c0_i32_0 = arith.constant 0 : i32
    %c0_i32_1 = arith.constant 0 : i32
    return %c0_i32, %c0_i32_0 : i32, i32
  }
  func.func @transform_4(%arg0: i32) -> (i32, i32) {
    %c0_i32 = arith.constant 0 : i32
    %c0_i32_0 = arith.constant 0 : i32
    %c0_i32_1 = arith.constant 0 : i32
    return %c0_i32, %c0_i32_0 : i32, i32
  }
  func.func @transform_5(%arg0: i32) -> (i32, i32) {
    %c0_i32 = arith.constant 0 : i32
    %c0_i32_0 = arith.constant 0 : i32
    %c0_i32_1 = arith.constant 0 : i32
    return %c0_i32, %c0_i32_0 : i32, i32
  }
  func.func @transform_6(%arg0: i32) -> (i32, i32) {
    %c0_i32 = arith.constant 0 : i32
    %c0_i32_0 = arith.constant 0 : i32
    %c0_i32_1 = arith.constant 0 : i32
    return %c0_i32, %c0_i32_0 : i32, i32
  }
  func.func @transform_7(%arg0: i32) -> (i32, i32) {
    %c0_i32 = arith.constant 0 : i32
    %c0_i32_0 = arith.constant 0 : i32
    %c0_i32_1 = arith.constant 0 : i32
    return %c0_i32, %c0_i32_0 : i32, i32
  }
  func.func @transform_8(%arg0: i32) -> (i32, i32, i32) {
    %c0_i32 = arith.constant 0 : i32
    %c0_i32_0 = arith.constant 0 : i32
    %c0_i32_1 = arith.constant 0 : i32
    return %arg0, %c0_i32, %c0_i32_0 : i32, i32, i32
  }
}

</mosaic_0001>

<bundles_post_ra>
// kernel: tpu_custom_call.1
= control target key start
LH: loop header
LB: loop body
LE: loop exit
PB: predicated region body
PF: predicated region fallthrough
CT: control target
= control target key end

     0   :  { %s2474_s0 = inlined_call_operand.hbm [shape: f32[2], index: 0, kind: input, shape index: {}]   ;;  %s2475_s1 = inlined_call_operand.hbm [shape: f32[2,8,32], index: 1, kind: input, shape index: {}]   ;;  %s2476_s2 = inlined_call_operand.hbm [shape: f32[8,8], index: 2, kind: input, shape index: {}]   ;;  %s2477_s3 = inlined_call_operand.hbm [shape: bf16[32,32], index: 3, kind: input, shape index: {}]   ;;  %s2478_s4 = inlined_call_operand.hbm [shape: bf16[32,32], index: 4, kind: input, shape index: {}]   ;;  %s2479_s5 = inlined_call_operand.hbm [shape: bf16[32,32], index: 5, kind: input, shape index: {}]   ;;  %s2480_s6 = inlined_call_operand.hbm [shape: bf16[32,32], index: 6, kind: input, shape index: {}]   ;;  %s2481_s7 = inlined_call_operand.vmem [shape: f32[4,32], index: 7, kind: input, shape index: {}]   ;;  %s2482_s8 = inlined_call_operand.hbm [shape: f32[2,8,32], index: 8, kind: output, shape index: {}]  }
   0x1   :  { %2487 = sst [smem:[#allocation22_spill]] %s2474_s0 }
   0x2   :  { %2488 = sst [smem:[#allocation23_spill]] %s2476_s2 }
   0x3   :  { %2489 = sst [smem:[#allocation24_spill]] %s2477_s3 }
   0x4   :  { %13 = vsyncpa [#allocation5], 0 }
   0x5   :  { %14 = vsyncpa [#allocation3], 0 }
   0x6   :  { %16 = vsyncpa [#allocation3 + $0x1], 0 }
   0x7   :  { %17 = vsyncpa [#allocation8], 0 }
   0x8   :  { %18 = vsyncpa [#allocation11], 0 }
   0x9   :  { %19 = vsyncpa [#allocation14], 0 }
   0xa   :  { %20 = vsyncpa [#allocation4], 0 }
   0xb   :  { %22 = vsyncpa [#allocation4 + $0x1], 0  ;;  %s2133_s27 = smov 0   ;;  %s2135_s28 = smov 0  }
   0xc   :  { %s2137_s29 = smov 0   ;;  %s2139_s30 = smov 0  }
   0xd LB: > { %s2070_s9 = smov [#allocation7]   ;;  %s2154_s11 = sadd.s32 4294967295, %s2068_s30   ;;  %s2068_s30 = sphi %s2139_s30, %s2518_s30   ;;  %s2064_s29 = sphi %s2137_s29, %s2517_s29   ;;  %s2060_s28 = sphi %s2135_s28, %s2516_s28   ;;  %s2056_s27 = sphi %s2133_s27, %s2515_s27  }
   0xe   : > { %s254_s10 = sshll.u32 %s2070_s9, 4  ;;  %p1522_p0 = scmp.ge.s32.totalorder %s2068_s30, 1  ;;  %s255_s10 = int_to_ptr.vmem [resolvable:$true] %s254_s10 }
   0xf   : > { %p2483_p1 = scmp.eq.s32.totalorder %s2154_s11, 0  ;;  %p232_p2 = scmp.lt.s32.totalorder %s2068_s30, 3 }
  0x10   : > { %s2071_s13 = smov [#allocation10]   ;;  %s2072_s16 = smov [#allocation9]  }
  0x11   : > { %p2159_p3 = pnand %p1522_p0, %p232_p2  ;;  %s277_s14 = sshll.u32 %s2071_s13, 4  ;;  %s278_s14 = int_to_ptr.vmem [resolvable:$true] %s277_s14 }
  0x12   : > { %s264_s17 = sshll.u32 %s2072_s16, 4  ;;  %s1830_s19 = scalar_lea.vmem %s255_s10, 128  ;;  %s265_s17 = int_to_ptr.vmem [resolvable:$true] %s264_s17 }
  0x13   : > { %s2490_s12 = scalar_select %p2159_p3, 1, 0 }
  0x14   : > { %p1702_p5 = pneg %p2159_p3  ;;  %p1831_p8 = scmp.ne.s32.totalorder %s255_s10, %s1830_s19 }
  0x15   : > { %p1838_p11 = scmp.lt.s32.totalorder %s255_s10, %s255_s10  ;;  %p1839_p12 = scmp.lt.s32.totalorder %s1830_s19, %s1830_s19 }
  0x16   : > { %p2168_p6 = pnand %p1702_p5, %p2483_p1 }
  0x17   : > { %p1840_p13 = por %p1839_p12, %p1838_p11 }
  0x18   : > { %p2174_p7 = pneg %p2168_p6 }
  0x1a   : > { %p1833_p9 = pnand %p1831_p8, %p2174_p7 }
  0x1c   : > { %p1834_p10 = pneg %p1833_p9 }
  0x1e   : > { %p1841_p0 = pnand %p1840_p13, %p1834_p10 }
  0x20   : > { %1844 = shalt.err (!%p1841_p0)
}
  0x21   : > { %s2493_s2 = sld [smem:[#allocation23_spill]]  ;;  %s1856_s22 = scalar_lea.vmem %s278_s14, 256 }
  0x22   : > { %p1857_p2 = scmp.ne.s32.totalorder %s278_s14, %s1856_s22  ;;  %p1864_p1 = scmp.lt.s32.totalorder %s278_s14, %s278_s14 }
  0x23   : > { %p1865_p8 = scmp.lt.s32.totalorder %s1856_s22, %s1856_s22 }
  0x24   : > { %p1859_p5 = pnand %p1857_p2, %p2174_p7 }
  0x25   : > { %p1866_p9 = por %p1865_p8, %p1864_p1 }
  0x26   : > { %p1860_p4 = pneg %p1859_p5 }
  0x27   : > { %1708 = dma.hbm_to_vmem [thread:$0]  (!%p2168_p6), %s2493_s2, 128, %s255_s10, [#allocation8]  }
  0x28   : > { %p1867_p3 = pnand %p1866_p9, %p1860_p4 }
  0x2a   : > { %1870 = shalt.err (!%p1867_p3)
}
  0x2b   : > { %s2073_s23 = smov 64   ;;  %s2074_s24 = smov 4  }
  0x2c   : > { %1714 = dma.hbm_to_vmem [thread:$0]  (!%p2168_p6), %s2478_s4, 256, %s278_s14, [#allocation11], %s2073_s23, %s2073_s23, %s2074_s24  }
  0x2d   : > { %s2075_s9 = smov [#allocation2]   ;;  %s2494_s0 = sld [smem:[#allocation22_spill]] }
  0x2e   : > { %s2076_s16 = smov [#allocation12]   ;;  %s1893_s20 = scalar_lea.vmem %s265_s17, 256 }
  0x2f   : > { %s290_s19 = sshll.u32 %s2076_s16, 4  ;;  %p1894_p1 = scmp.ne.s32.totalorder %s265_s17, %s1893_s20  ;;  %s291_s19 = int_to_ptr.vmem [resolvable:$true] %s290_s19 }
  0x30   : > { %p1901_p10 = scmp.lt.s32.totalorder %s265_s17, %s265_s17  ;;  %p1902_p11 = scmp.lt.s32.totalorder %s1893_s20, %s1893_s20 }
  0x31   : > { %p1896_p3 = pnand %p1894_p1, %p2174_p7 }
  0x32   : > { %p1903_p12 = por %p1902_p11, %p1901_p10 }
  0x33   : > { %1705 = dma.hbm_to_smem (!%p2168_p6), %s2494_s0, 16, %s2075_s9, [#allocation5]  }
  0x34   : > { %p1897_p4 = pneg %p1896_p3 }
  0x36   : > { %p1904_p13 = pnand %p1903_p12, %p1897_p4 }
  0x38   : > { %1907 = shalt.err (!%p1904_p13)
}
  0x39   : > { %s2495_s3 = sld [smem:[#allocation24_spill]]  ;;  %s1919_s22 = scalar_lea.vmem %s291_s19, 256 }
  0x3a   : > { %p1920_p0 = scmp.ne.s32.totalorder %s291_s19, %s1919_s22  ;;  %p1927_p8 = scmp.lt.s32.totalorder %s291_s19, %s291_s19 }
  0x3b   : > { %p1928_p9 = scmp.lt.s32.totalorder %s1919_s22, %s1919_s22 }
  0x3c   : > { %p1922_p2 = pnand %p1920_p0, %p2174_p7 }
  0x3d   : > { %p1929_p1 = por %p1928_p9, %p1927_p8 }
  0x3e   : > { %p1923_p5 = pneg %p1922_p2 }
  0x3f   : > { %1711 = dma.hbm_to_vmem [thread:$0]  (!%p2168_p6), %s2495_s3, 256, %s265_s17, [#allocation8], %s2073_s23, %s2073_s23, %s2074_s24  }
  0x40   : > { %p1930_p3 = pnand %p1929_p1, %p1923_p5 }
  0x42   : > { %1933 = shalt.err (!%p1930_p3)
}
  0x43   : > { %1717 = dma.hbm_to_vmem [thread:$0]  (!%p2168_p6), %s2479_s5, 256, %s291_s19, [#allocation11], %s2073_s23, %s2073_s23, %s2074_s24  }
  0x44   : > { %s2077_s17 = smov [#allocation13]  }
  0x45   : > { %s303_s9 = sshll.u32 %s2077_s17, 4  ;;  %s304_s9 = int_to_ptr.vmem [resolvable:$true] %s303_s9 }
  0x46   : > { %s1945_s10 = scalar_lea.vmem %s304_s9, 256  ;;  %p1953_p12 = scmp.lt.s32.totalorder %s304_s9, %s304_s9 }
  0x47   : > { %p1946_p4 = scmp.ne.s32.totalorder %s304_s9, %s1945_s10  ;;  %p1954_p13 = scmp.lt.s32.totalorder %s1945_s10, %s1945_s10 }
  0x49   : > { %p1948_p10 = pnand %p1946_p4, %p2174_p7  ;;  %p1955_p0 = por %p1954_p13, %p1953_p12 }
  0x4b   : > { %p1949_p11 = pneg %p1948_p10 }
  0x4d   : > { %p1956_p2 = pnand %p1955_p0, %p1949_p11 }
  0x4f   : > { %1959 = shalt.err (!%p1956_p2)
}
  0x50   : > { %1720 = dma.hbm_to_vmem [thread:$0]  (!%p2168_p6), %s2480_s6, 256, %s304_s9, [#allocation14], %s2073_s23, %s2073_s23, %s2074_s24  }
  0x51   : > { %s1521_s15 = sadd.s32 4294967294, %s2068_s30   ;;  %s2232_s18 = sadd.s32 1, %s2068_s30  }
  0x52   : > { %s53_s19 = ssub.s32 %s2068_s30, %s2232_s18  ;;  %s56_s20 = sadd.s32 1, %s2064_s29 }
  0x53   : > { %p54_p7 = scmp.eq.s32.totalorder %s53_s19, 0  ;;  %p63_p5 = scmp.ne.s32.totalorder %s2064_s29, %s2060_s28 }
  0x54   : > { %p64_p8 = scmp.eq.s32.totalorder %s2068_s30, 0  ;;  %p69_p9 = scmp.ne.s32.totalorder %s2060_s28, %s2056_s27 }
  0x55   : > { %s2243_s14 = scalar_select %p54_p7, %s2064_s29, %s56_s20  }
  0x56   : > { %p2245_p1 = por %p64_p8, %p63_p5  ;;  %p2497_p3 = scmp.eq.s32.totalorder %s2154_s11, 0 }
  0x57   : > { %p219_p4 = scmp.eq.s32.totalorder %s2154_s11, 1  ;;  %p225_p10 = scmp.eq.s32.totalorder %s1521_s15, 1 }
  0x58   : > { %p2251_p6 = por %p2497_p3, %p69_p9  ;;  %p1735_p11 = scmp.lt.s32.totalorder %s2068_s30, 2 }
  0x59   : > { %s320_s24 = sand.u32 1, %s2064_s29   ;;  %p2258_p12 = por %p219_p4, %p63_p5 }
  0x5a   : > { %s2498_s23 = scalar_select %p2251_p6, 1, 0 }
  0x5b   : > { %s2499_s22 = scalar_select %p2258_p12, 1, 0 }
  0x5c   : > { %p2262_p13 = por %p225_p10, %p69_p9  ;;  %s1530_s26 = sshll.u32 %s320_s24, 3 }
  0x5d   : > { %s1531_s17 = sshll.u32 %s2068_s30, 7  ;;  %s324_s16 = scalar_lea.vmem [#allocation6], %s1530_s26 }
  0x5e   : > { %s2500_s25 = scalar_select %p2262_p13, 1, 0 }
  0x5f   : > { %s2270_s13 = scalar_lea.hbm %s2475_s1, %s1531_s17  ;;  %s331_s15 = sshll.u32 %s324_s16, 4  ;;  %s332_s15 = int_to_ptr.vmem [resolvable:$true] %s331_s15 }
  0x60   : > { %p2274_p0 = pnand %p1735_p11, %p2245_p1  ;;  %s321_s20 = scalar_lea.sflag [#allocation3], %s320_s24 }
  0x61   : > { %s1960_s0 = scalar_lea.hbm %s2270_s13, 128  ;;  %s1965_s10 = scalar_lea.hbm %s2475_s1, 256 }
  0x62   : > { %p1961_p2 = scmp.ne.s32.totalorder %s2270_s13, %s1960_s0  ;;  %p1962_p7 = pneg %p2274_p0 }
  0x63   : > { %p1966_p9 = scmp.lt.s32.totalorder %s2270_s13, %s2475_s1  ;;  %p1967_p1 = scmp.lt.s32.totalorder %s1965_s10, %s1960_s0 }
  0x64   : > { %p1963_p5 = pnand %p1962_p7, %p1961_p2 }
  0x65   : > { %p1968_p3 = por %p1967_p1, %p1966_p9 }
  0x66   : > { %p1964_p8 = pneg %p1963_p5 }
  0x68   : > { %p1969_p4 = pnand %p1968_p3, %p1964_p8 }
  0x6a   : > { %1972 = shalt.err (!%p1969_p4)
}
  0x6b   : > { %s1973_s21 = scalar_lea.vmem %s332_s15, 128  ;;  %s2078_s24 = smov [#allocation6]  }
  0x6c   : > { %p1974_p10 = scmp.ne.s32.totalorder %s332_s15, %s1973_s21  ;;  %s1978_s2 = sshll.u32 %s2078_s24, 4  ;;  %s1979_s2 = int_to_ptr.vmem [resolvable:$false] %s1978_s2 }
  0x6d   : > { %s1980_s3 = scalar_lea.vmem %s1979_s2, 256  ;;  %p1981_p2 = scmp.lt.s32.totalorder %s332_s15, %s1979_s2 }
  0x6e   : > { %p1976_p11 = pnand %p1974_p10, %p1962_p7  ;;  %p1982_p5 = scmp.lt.s32.totalorder %s1980_s3, %s1973_s21 }
  0x70   : > { %p1977_p13 = pneg %p1976_p11  ;;  %p1983_p12 = por %p1982_p5, %p1981_p2 }
  0x72   : > { %p1984_p6 = pnand %p1983_p12, %p1977_p13 }
  0x74   : > { %1987 = shalt.err (!%p1984_p6)
}
  0x75   : > { %1724 = dma.hbm_to_vmem [thread:$0]  (!%p2274_p0), %s2270_s13, 128, %s332_s15, %s321_s20  }
  0x76   : > { %p2502_p8 = scmp.ne.s32.totalorder %s2490_s12, 0 }
  0x77   : > { %p2503_p9 = scmp.eq.s32.totalorder (!%p2502_p8), %s2154_s11, 0 }
  0x78   : > { %340 = sbr.rel (%p2502_p8) target bundleno = 1875 (0x753), region = 52 }
  0x7d   : > { %2031 = dma.done.wait (%p2503_p9), [#allocation5], 16   ;;  %p2504_p7 = pmov %p2503_p9 }
  0x7e   : > { %s2299_s0 = sand.u32 1, %s2060_s28   ;;  %p2505_p6 = scmp.ne.s32.totalorder %s2498_s23, 0 }
  0x7f   : > { %2033 = vsyncadd (%p2504_p7), [#allocation5], 4294967280  ;;  %s1534_s2 = sshll.u32 %s2299_s0, 3  ;;  %s347_s3 = scalar_lea.sflag [#allocation3], %s2299_s0 }
  0x80   : > { %s350_s13 = scalar_lea.vmem [#allocation6], %s1534_s2 }
  0x81   : > { %2035 = dma.done.wait (%p2505_p6), %s347_s3, 128  }
  0x82   : > { %2037 = vsyncadd (%p2505_p6), %s347_s3, 4294967168  ;;  %p2506_p12 = pmov %p2504_p7 }
  0x83   : > { %p2507_p13 = pmov %p2504_p7 }
  0x84   : > { %2039 = dma.done.wait (%p2506_p12), [#allocation8], 384  }
  0x85   : > { %2041 = vsyncadd (%p2507_p13), [#allocation8], 4294966912  ;;  %p2508_p0 = pmov %p2504_p7 }
  0x87   : > { %2043 = dma.done.wait (%p2508_p0), [#allocation11], 512   ;;  %p2509_p1 = pmov %p2508_p0 }
  0x88   : > { %p2510_p3 = pmov %p2508_p0 }
  0x89   : > { %2045 = vsyncadd (%p2509_p1), [#allocation11], 4294966784 }
  0x8a   : > { %2047 = dma.done.wait (%p2510_p3), [#allocation14], 256   ;;  %p2511_p4 = pmov %p2508_p0 }
  0x8c   : > { %2049 = vsyncadd (%p2511_p4), [#allocation14], 4294967040 }
  0x8d   : > { %375 = sfence }
  0x8e   : > { %v2321_v0 = vld [vmem:[%s350_s13] sm:$0xff]  ;;  %vm408_vm0 = vcmask 261120   ;;  %v2079_v9 = vmov 0.0   ;;  %v1793_v10 = vld [vmem:[#allocation9] sm:$0xff]   ;;  %vm2080_vm1 = vmmov 0   ;;  %s405_s12 = sld [smem:[#allocation2]] }
  0x8f   : > { %v409_v1 = vsel %vm408_vm0, %v2321_v0, 0.0  ;;  %v1791_v7 = vld [vmem:[#allocation9 + $0x8] sm:$0xff]   ;;  %1602 = vmatprep.subr.bf16.mxu1 %v2079_v9  ;;  %1618 = vmatprep.subr.bf16.mxu0 %v2079_v9  ;;  %v1794_v11 = vld [vmem:[#allocation12] sm:$0xff]   ;;  %s1541_s23 = sld [smem:[#allocation2 + $0x1]]  ;;  %v1795_v26 = vld [vmem:[#allocation10 + $0x8] sm:$0xff]   ;;  %s2081_s20 = smov 120  }
  0x90   : > { %410 = vadd.xlane.f32.xlu0 %v409_v1  ;;  %v1792_v8 = vld [vmem:[#allocation12 + $0x8] sm:$0xff]   ;;  %1603 = vmatpush3.bf16.msra.mxu1 %v1791_v7  ;;  %v1796_v28 = vld [vmem:[#allocation10] sm:$0xff]   ;;  %vm623_vm4 = vcmask 64512   ;;  %s2082_s16 = smov 112   ;;  %s2083_s21 = smov 104   ;;  %v622_v53 = vld [vmem:[#allocation7] sm:$0xff] }
  0x91   : > { %1619 = vmatpush3.bf16.msra.mxu0 %v1792_v8  ;;  %1604 = vmatprep.subr.bf16.mxu1 %v2079_v9  ;;  %v1542_v29 = vld [vmem:[%s2481_s7] ss:$0 sm:$0xff]  ;;  %v1546_v39 = vld [vmem:[%s2481_s7 + $0x1] ss:$0 sm:$0xff]  ;;  %v1550_v43 = vld [vmem:[%s2481_s7 + $0x2] ss:$0 sm:$0xff] }
  0x92   : > { %1620 = vmatprep.subr.bf16.mxu0 %v2079_v9  ;;  %1606 = vmatprep.mubr.msk.bf16.mxu1 %vm2080_vm1, %v2079_v9  ;;  %vm701_vm5 = vcmp.eq.f32.partialorder %v622_v53, 0.0  ;;  %s2084_s24 = smov 8   ;;  %s2085_s3 = smov 16   ;;  %vm1306_vm6 = vcmask 130048   ;;  %vm1308_vm7 = vcmask 195584  }
  0x93   : > { %1622 = vmatprep.mubr.msk.bf16.mxu0 %vm2080_vm1, %v2079_v9  ;;  %s2086_s13 = smov 24   ;;  %s1571_s15 = sshll.u32 %s2154_s11, 7 }
  0x94   : > { %1605 = vmatpush3.bf16.msra.mxu1 %v1793_v10  ;;  %v429_v20 = vstv %s405_s12  ;;  %s403_s19 = scalar_lea.vmem [#allocation15], %s1534_s2  ;;  %s2430_s10 = scalar_lea.hbm %s2482_s8, %s1571_s15 }
  0x95   : > { %1621 = vmatpush3.bf16.msra.mxu0 %v1794_v11  ;;  %1610 = vmatprep.subr.bf16.mxu1 %v2079_v9  ;;  %v433_v23 = vstv %s1541_s23  ;;  %s1378_s11 = scalar_lea.sflag [#allocation4], %s2299_s0  ;;  %p2512_p11 = scmp.ne.s32.totalorder %s2499_s22, 0 }
  0x96   : > { %1636 = vmatprep.subr.mxu0 %v2079_v9  ;;  %s2087_s26 = smov [#allocation15]  }
 0x119   : > { %v411_v2 = vpop.xlane.xlu0 %410 }
 0x11a   : > { %v413_v3 = vmul.f32 0.03125, %v411_v2 }
 0x11c   : > { %v414_v4 = vsub.f32 %v2321_v0, %v413_v3 }
 0x11e   : > { %v415_v5 = vmul.f32 %v414_v4, %v414_v4 }
 0x120   : > { %v416_v6 = vsel %vm408_vm0, %v415_v5, 0.0 }
 0x121   : > { %417 = vadd.xlane.f32.xlu0 %v416_v6 }
 0x1aa   : > { %v418_v12 = vpop.xlane.xlu0 %417 }
 0x1ab   : > { %v420_v13 = vmul.f32 0.032258064, %v418_v12 }
 0x1ad   : > { %1799 = vrsqrt.f32 %v420_v13  ;;  %vm423_vm2 = vcmp.eq.f32.partialorder %v420_v13, inf  ;;  %v426_v16 = vand.u32 2147483648, %v420_v13  ;;  %vm425_vm3 = vcmp.eq.f32.partialorder %v420_v13, 0.0 }
 0x1ba   : > { %v1800_v14 = vpop.eup %1799 }
 0x1bb   : > { %v422_v15 = vmul.f32 %v1800_v14, %v420_v13 }
 0x1bd   : > { %v424_v17 = vsel %vm423_vm2, %v420_v13, %v422_v15 }
 0x1be   : > { %v427_v18 = vsel %vm425_vm3, %v426_v16, %v424_v17 }
 0x1bf   : > { %v428_v19 = vadd.f32 1e-06, %v427_v18 }
 0x1c1   : > { %1801 = vrcp.f32 %v428_v19 }
 0x1ce   : > { %v1802_v21 = vpop.eup %1801 }
 0x1cf   : > { %v431_v22 = vmul.f32 %v1802_v21, %v429_v20 }
 0x1d1   : > { %v432_v24 = vmul.f32 %v431_v22, %v414_v4 }
 0x1d3   : > { %v434_v25 = vadd.f32 %v433_v23, %v432_v24 }
 0x1d5   : > { %v435_v27 = vpack.c.bf16 %v434_v25, %v434_v25 }
 0x1d7   : > { %1607 = vmatmul.mubr.msk.bf16.vlgmr.msra.gmra.mxu1 %vm408_vm0, %v435_v27  ;;  %1623 = vmatmul.mubr.msk.bf16.vlgmr.msra.gmra.mxu0 %vm408_vm0, %v435_v27 }
 0x1d8   : > { %1611 = vmatpush3.bf16.msra.mxu1 %v1795_v26  ;;  %1614 = vmatprep.mubr.msk.bf16.mxu1 %vm2080_vm1, %v2079_v9 }
 0x1d9   : > { %1612 = vmatprep.subr.bf16.mxu1 %v2079_v9  ;;  %1638 = vmatprep.mubr.msk.f32.mxu0 %vm2080_vm1, %v2079_v9 }
 0x1dc   : > { %1613 = vmatpush3.bf16.msra.mxu1 %v1796_v28 }
 0x1dd   : > { %1626 = vmatprep.subr.mxu1 %v2079_v9 }
 0x1df   : > { %1615 = vmatmul.mubr.msk.bf16.vlgmr.msra.gmra.mxu1 %vm408_vm0, %v435_v27 }
 0x1e0   : > { %1628 = vmatprep.mubr.msk.f32.mxu1 %vm2080_vm1, %v2079_v9 }
 0x297   : > { %v494_v30 = vpop.f32.mrf.mxu1  ;;  %v616_v31 = vpop.f32.mrf.mxu0 }
 0x298   : > { %v495_v32 = vadd.f32 %v1542_v29, %v494_v30  ;;  %v2362_v45 = vadd.f32 %v1550_v43, %v616_v31 }
 0x299   : > { %v1608_v33 = vpop.f32.mrf.mxu1  ;;  %v1624_v34 = vpop.f32.mrf.mxu0 }
 0x29a   : > { %788 = vrot.lane.b32.xlu1 %v495_v32, %s2081_s20 }
 0x29b   : > { %v497_v35 = vpop.f32.mrf.mxu1  ;;  %v619_v36 = vpop.f32.mrf.mxu0 }
 0x29d   : > { %v1609_v37 = vpop.f32.mrf.mxu1  ;;  %v1625_v38 = vpop.f32.mrf.mxu0 }
 0x29f   : > { %v555_v40 = vpop.f32.mrf.mxu1 }
 0x2a0   : > { %v556_v41 = vadd.f32 %v1546_v39, %v555_v40 }
 0x2a1   : > { %v1616_v42 = vpop.f32.mrf.mxu1 }
 0x2a2   : > { %959 = vrot.lane.b32.xlu0 %v556_v41, %s2082_s16  ;;  %790 = vrot.lane.b32.xlu1 %v556_v41, %s2081_s20 }
 0x2a3   : > { %1627 = vmatpush3.xpose.msk.msra.mxu1 %vm623_vm4, %v556_v41  ;;  %v558_v44 = vpop.f32.mrf.mxu1 }
 0x2a4   : > { %1631 = vmatprep.subr.mxu1 %v2079_v9 }
 0x2a5   : > { %v1617_v46 = vpop.f32.mrf.mxu1 }
 0x2a6   : > { %1629 = vmatmul.mubr.msk.f32.vlgmr.msra.gmra.mxu1 %vm623_vm4, %v495_v32  ;;  %957 = vrot.lane.b32.xlu1 %v495_v32, %s2082_s16 }
 0x2a7   : > { %1632 = vmatpush3.msra.mxu1 %v2362_v45  ;;  %1633 = vmatprep.mubr.msk.f32.mxu1 %vm2080_vm1, %v2079_v9 }
 0x2a8   : > { %1641 = vmatprep.subr.mxu1 %v2079_v9 }
 0x2aa   : > { %1127 = vrot.lane.b32.xlu1 %v556_v41, %s2083_s21 }
 0x2ae   : > { %1125 = vrot.lane.b32.xlu1 %v495_v32, %s2083_s21 }
 0x30c   : > { %v789_v47 = vpop.permute.xlu1 %788 }
 0x314   : > { %v791_v48 = vpop.permute.xlu1 %790  ;;  %v960_v49 = vpop.permute.xlu0 %959 }
 0x315   : > { %1637 = vmatpush3.xpose.msk.msra.mxu0 %vm623_vm4, %v791_v48 }
 0x316   : > { %1646 = vmatprep.subr.mxu0 %v2079_v9 }
 0x318   : > { %1639 = vmatmul.mubr.msk.f32.vlgmr.msra.gmra.mxu0 %vm623_vm4, %v789_v47  ;;  %v958_v50 = vpop.permute.xlu1 %957 }
 0x319   : > { %1647 = vmatpush3.xpose.msk.msra.mxu0 %vm623_vm4, %v960_v49  ;;  %1648 = vmatprep.mubr.msk.f32.mxu0 %vm2080_vm1, %v2079_v9  ;;  %v1797_v49 = vld [vmem:[#allocation13 + $0x8] sm:$0xff]  }
 0x31a   : > { %1656 = vmatprep.subr.mxu0 %v2079_v9 }
 0x31c   : > { %1649 = vmatmul.mubr.msk.f32.vlgmr.msra.gmra.mxu0 %vm623_vm4, %v958_v50  ;;  %v1128_v51 = vpop.permute.xlu1 %1127 }
 0x31d   : > { %1657 = vmatpush3.xpose.msk.msra.mxu0 %vm623_vm4, %v1128_v51  ;;  %1658 = vmatprep.mubr.msk.f32.mxu0 %vm2080_vm1, %v2079_v9 }
 0x31e   : > { %1666 = vmatprep.subr.bf16.mxu0 %v2079_v9 }
 0x320   : > { %v1126_v52 = vpop.permute.xlu1 %1125 }
 0x321   : > { %1659 = vmatmul.mubr.msk.f32.vlgmr.msra.gmra.mxu0 %vm623_vm4, %v1126_v52 }
 0x322   : > { %1670 = vmatprep.mubr.msk.bf16.mxu0 %vm2080_vm1, %v2079_v9  ;;  %1667 = vmatpush3.bf16.msra.mxu0 %v1797_v49 }
 0x323   : > { %1668 = vmatprep.subr.bf16.mxu0 %v2079_v9 }
 0x366   : > { %v696_v54 = vpop.f32.mrf.mxu1 }
 0x367   : > { %v700_v55 = vmul.f32 0.35355338, %v696_v54  ;;  %v1798_v54 = vld [vmem:[#allocation13] sm:$0xff]  }
 0x368   : > { %v1630_v56 = vpop.f32.mrf.mxu1  ;;  %1669 = vmatpush3.bf16.msra.mxu0 %v1798_v54 }
 0x369   : > { %v702_v57 = vsel %vm701_vm5, -1e+09, %v700_v55 }
 0x36a   : > { %v703_v58 = vsel %vm623_vm4, %v702_v57, -inf }
 0x36b   : > { %704 = vmax.xlane.f32.xlu1 %v703_v58 }
 0x3d8   : > { %v862_v59 = vpop.f32.mrf.mxu0 }
 0x3d9   : > { %v866_v60 = vmul.f32 0.35355338, %v862_v59 }
 0x3da   : > { %v1640_v61 = vpop.f32.mrf.mxu0 }
 0x3db   : > { %v867_v62 = vsel %vm701_vm5, -1e+09, %v866_v60 }
 0x3dc   : > { %v1031_v63 = vpop.f32.mrf.mxu0  ;;  %v868_v1 = vsel %vm623_vm4, %v867_v62, -inf }
 0x3dd   : > { %v1035_v2 = vmul.f32 0.35355338, %v1031_v63  ;;  %869 = vmax.xlane.f32.xlu0 %v868_v1  ;;  %v1566_v63 = vld [vmem:[%s2481_s7 + $0x3] ss:$0 sm:$0xff] }
 0x3de   : > { %v1650_v3 = vpop.f32.mrf.mxu0 }
 0x3df   : > { %v1036_v4 = vsel %vm701_vm5, -1e+09, %v1035_v2 }
 0x3e0   : > { %v1037_v5 = vsel %vm623_vm4, %v1036_v4, -inf }
 0x3e1   : > { %v1199_v6 = vpop.f32.mrf.mxu0  ;;  %1038 = vmax.xlane.f32.xlu1 %v1037_v5 }
 0x3e2   : > { %v1203_v7 = vmul.f32 0.35355338, %v1199_v6 }
 0x3e3   : > { %v1660_v8 = vpop.f32.mrf.mxu0 }
 0x3e4   : > { %v1204_v10 = vsel %vm701_vm5, -1e+09, %v1203_v7 }
 0x3e5   : > { %v1205_v11 = vsel %vm623_vm4, %v1204_v10, -inf }
 0x3e6   : > { %1206 = vmax.xlane.f32.xlu1 %v1205_v11 }
 0x3f4   : > { %v705_v12 = vpop.xlane.xlu1 %704 }
 0x3f5   : > { %v706_v13 = vsub.f32 %v702_v57, %v705_v12 }
 0x3f7   : > { %v707_v14 = vmul.f32 1.442695, %v706_v13 }
 0x3f9   : > { %1803 = vpow2.f32 %v707_v14 }
 0x406   : > { %v1804_v15 = vpop.eup %1803 }
 0x407   : > { %v709_v16 = vsel %vm623_vm4, %v1804_v15, 0.0 }
 0x408   : > { %710 = vadd.xlane.f32.xlu0 %v709_v16 }
 0x466   : > { %v870_v17 = vpop.xlane.xlu0 %869 }
 0x467   : > { %v871_v18 = vsub.f32 %v867_v62, %v870_v17 }
 0x469   : > { %v872_v19 = vmul.f32 1.442695, %v871_v18 }
 0x46a   : > { %v1039_v20 = vpop.xlane.xlu1 %1038 }
 0x46b   : > { %1805 = vpow2.f32 %v872_v19  ;;  %v1040_v21 = vsub.f32 %v1036_v4, %v1039_v20 }
 0x46d   : > { %v1041_v22 = vmul.f32 1.442695, %v1040_v21 }
 0x46f   : > { %1807 = vpow2.f32 %v1041_v22  ;;  %v1207_v28 = vpop.xlane.xlu1 %1206 }
 0x470   : > { %v1208_v29 = vsub.f32 %v1204_v10, %v1207_v28 }
 0x472   : > { %v1209_v30 = vmul.f32 1.442695, %v1208_v29 }
 0x478   : > { %v1806_v23 = vpop.eup %1805 }
 0x479   : > { %v874_v24 = vsel %vm623_vm4, %v1806_v23, 0.0 }
 0x47a   : > { %875 = vadd.xlane.f32.xlu1 %v874_v24 }
 0x47c   : > { %v1808_v25 = vpop.eup %1807 }
 0x47d   : > { %v1043_v26 = vsel %vm623_vm4, %v1808_v25, 0.0 }
 0x47e   : > { %1044 = vadd.xlane.f32.xlu0 %v1043_v26 }
 0x48b   : > { %1049 = vrot.lane.b32.xlu1 %v2362_v45, %s2082_s16  ;;  %s1992_s16 = sshll.u32 %s2087_s26, 4  ;;  %s1993_s16 = int_to_ptr.vmem [resolvable:$false] %s1992_s16 }
 0x491   : > { %v711_v27 = vpop.xlane.xlu0 %710 }
 0x492   : > { %1809 = vrcp.f32 %v711_v27 }
 0x493   : > { %1811 = vpow2.f32 %v1209_v30 }
 0x494   : > { %881 = vrot.lane.b32.xlu0 %v2362_v45, %s2081_s20  ;;  %s1391_s20 = sshll.u32 %s403_s19, 4  ;;  %s2432_s20 = int_to_ptr.vmem [resolvable:$true] %s1391_s20 }
 0x495   : > { %s1988_s2 = scalar_lea.vmem %s2432_s20, 128  ;;  %p1995_p8 = scmp.lt.s32.totalorder %s2432_s20, %s1993_s16 }
 0x496   : > { %p1989_p10 = scmp.ne.s32.totalorder %s2432_s20, %s1988_s2 }
 0x498   : > { %p1990_p2 = pnand %p1989_p10, %p2512_p11 }
 0x49a   : > { %p1991_p5 = pneg %p1990_p2 }
 0x49f   : > { %v1810_v31 = vpop.eup %1809 }
 0x4a0   : > { %v714_v32 = vmul.f32 %v1810_v31, %v1804_v15  ;;  %v1812_v33 = vpop.eup %1811 }
 0x4a1   : > { %v1211_v34 = vsel %vm623_vm4, %v1812_v33, 0.0 }
 0x4a2   : > { %1634 = vmatmul.mubr.msk.f32.vlgmr.msra.gmra.mxu1 %vm623_vm4, %v714_v32 }
 0x4a3   : > { %1643 = vmatprep.mubr.msk.f32.mxu1 %vm2080_vm1, %v2079_v9 }
 0x4af   : > { %1212 = vadd.xlane.f32.xlu1 %v1211_v34 }
 0x4c0   : > { %1217 = vrot.lane.b32.xlu1 %v2362_v45, %s2083_s21  ;;  %s1994_s21 = scalar_lea.vmem %s1993_s16, 256 }
 0x4c1   : > { %p1996_p9 = scmp.lt.s32.totalorder %s1994_s21, %s1988_s2 }
 0x4c3   : > { %p1997_p7 = por %p1996_p9, %p1995_p8 }
 0x4c5   : > { %p1998_p6 = pnand %p1997_p7, %p1991_p5 }
 0x503   : > { %v876_v35 = vpop.xlane.xlu1 %875 }
 0x504   : > { %1813 = vrcp.f32 %v876_v35 }
 0x507   : > { %v1045_v36 = vpop.xlane.xlu0 %1044  ;;  %v1050_v40 = vpop.permute.xlu1 %1049 }
 0x508   : > { %1815 = vrcp.f32 %v1045_v36 }
 0x50b   : > { %v882_v37 = vpop.permute.xlu0 %881 }
 0x50c   : > { %1642 = vmatpush3.msra.mxu1 %v882_v37 }
 0x50d   : > { %1651 = vmatprep.subr.mxu1 %v2079_v9 }
 0x511   : > { %v1814_v38 = vpop.eup %1813 }
 0x512   : > { %v879_v39 = vmul.f32 %v1814_v38, %v1806_v23 }
 0x514   : > { %1644 = vmatmul.mubr.msk.f32.vlgmr.msra.gmra.mxu1 %vm623_vm4, %v879_v39 }
 0x515   : > { %v1816_v41 = vpop.eup %1815  ;;  %1652 = vmatpush3.msra.mxu1 %v1050_v40  ;;  %1653 = vmatprep.mubr.msk.f32.mxu1 %vm2080_vm1, %v2079_v9 }
 0x516   : > { %v1048_v42 = vmul.f32 %v1816_v41, %v1808_v25  ;;  %1661 = vmatprep.subr.mxu1 %v2079_v9 }
 0x518   : > { %1654 = vmatmul.mubr.msk.f32.vlgmr.msra.gmra.mxu1 %vm623_vm4, %v1048_v42 }
 0x519   : > { %1663 = vmatprep.mubr.msk.f32.mxu1 %vm2080_vm1, %v2079_v9 }
 0x538   : > { %v1213_v43 = vpop.xlane.xlu1 %1212 }
 0x539   : > { %1817 = vrcp.f32 %v1213_v43 }
 0x53c   : > { %v1218_v44 = vpop.permute.xlu1 %1217 }
 0x53d   : > { %1662 = vmatpush3.msra.mxu1 %v1218_v44 }
 0x546   : > { %v1818_v45 = vpop.eup %1817 }
 0x547   : > { %v1216_v46 = vmul.f32 %v1818_v45, %v1812_v33 }
 0x549   : > { %1664 = vmatmul.mubr.msk.f32.vlgmr.msra.gmra.mxu1 %vm623_vm4, %v1216_v46 }
 0x562   : > { %v784_v47 = vpop.f32.mrf.mxu1 }
 0x564   : > { %v1635_v48 = vpop.f32.mrf.mxu1 }
 0x5d4   : > { %v953_v50 = vpop.f32.mrf.mxu1 }
 0x5d5   : > { %1294 = vrot.lane.b32.xlu0 %v953_v50, %s2084_s24 }
 0x5d6   : > { %v1645_v51 = vpop.f32.mrf.mxu1 }
 0x5d8   : > { %v1121_v52 = vpop.f32.mrf.mxu1 }
 0x5d9   : > { %1298 = vrot.lane.b32.xlu1 %v1121_v52, %s2085_s3 }
 0x5da   : > { %v1655_v53 = vpop.f32.mrf.mxu1 }
 0x609   : > { %v1289_v55 = vpop.f32.mrf.mxu1 }
 0x60a   : > { %1302 = vrot.lane.b32.xlu0 %v1289_v55, %s2086_s13 }
 0x60b   : > { %v1665_v56 = vpop.f32.mrf.mxu1 }
 0x647   : > { %v1295_v57 = vpop.permute.xlu0 %1294 }
 0x648   : > { %v1305_v9 = vsel %vm623_vm4, %v784_v47, %v1295_v57 }
 0x64b   : > { %v1299_v58 = vpop.permute.xlu1 %1298 }
 0x64c   : > { %v1307_v59 = vsel %vm1306_vm6, %v1305_v9, %v1299_v58 }
 0x67c   : > { %v1303_v60 = vpop.permute.xlu0 %1302 }
 0x67d   : > { %v1309_v61 = vsel %vm1308_vm7, %v1307_v59, %v1303_v60 }
 0x67e   : > { %v1310_v62 = vpack.c.bf16 %v1309_v61, %v1309_v61 }
 0x680   : > { %1671 = vmatmul.mubr.msk.bf16.vlgmr.msra.gmra.mxu0 %vm408_vm0, %v1310_v62 }
 0x740   : > { %v1369_v1 = vpop.f32.mrf.mxu0 }
 0x741   : > { %v1370_v2 = vadd.f32 %v1566_v63, %v1369_v1 }
 0x742   : > { %v1672_v3 = vpop.f32.mrf.mxu0 }
 0x743   : > { %v1375_v4 = vadd.f32 %v1370_v2, %v2321_v0 }
 0x744   : > { %v1372_v5 = vpop.f32.mrf.mxu0 }
 0x745   : > { %1376 = vst.msk [vmem:[%s403_s19] sm:$0xff] %vm408_vm0, %v1375_v4 }
 0x746   : > { %v1673_v6 = vpop.f32.mrf.mxu0 }
 0x747   : > { %2001 = shalt.err (!%p1998_p6)
}
 0x748   : > { %s2002_s24 = scalar_lea.hbm %s2430_s10, 128  ;;  %s2006_s13 = scalar_lea.hbm %s2482_s8, 256 }
 0x749   : > { %p2003_p12 = scmp.ne.s32.totalorder %s2430_s10, %s2002_s24  ;;  %p2007_p1 = scmp.lt.s32.totalorder %s2430_s10, %s2482_s8 }
 0x74a   : > { %p2008_p3 = scmp.lt.s32.totalorder %s2006_s13, %s2002_s24 }
 0x74b   : > { %p2004_p13 = pnand %p2003_p12, %p2512_p11 }
 0x74c   : > { %p2009_p4 = por %p2008_p3, %p2007_p1 }
 0x74d   : > { %p2005_p0 = pneg %p2004_p13 }
 0x74f   : > { %p2010_p10 = pnand %p2009_p4, %p2005_p0 }
 0x751   : > { %2013 = shalt.err (!%p2010_p10)
}
 0x752   : > { %1700 = dma.vmem_to_hbm [thread:$0]  (%p2512_p11), %s2432_s20, 128, %s2430_s10, %s1378_s11  }
 0x753 PF: > { %s1403_s15 = sand.u32 1, %s2056_s27   ;;  %p2513_p2 = scmp.ne.s32.totalorder %s2500_s25, 0 }
 0x754   : > { %p2514_p5 = scmp.ge.s32.totalorder %s2068_s30, 2  ;;  %s1404_s19 = scalar_lea.sflag [#allocation4], %s1403_s15 }
 0x756   : > { %p1726_p8 = pnand %p2514_p5, %p2513_p2 }
 0x758   : > { %p1727_p9 = pneg %p1726_p8 }
 0x75a   : > { %2051 = dma.done.wait (%p1727_p9), %s1404_s19, 128  }
 0x75b   : > { %2053 = vsyncadd (%p1727_p9), %s1404_s19, 4294967168  ;;  %p25_p7 = scmp.ge.s32.totalorder %s2232_s18, 4   ;;  %s2515_s27 = smov %s2060_s28 }
 0x75c   : > { %s2516_s28 = smov %s2064_s29  ;;  %s2517_s29 = smov %s2243_s14 }
 0x75d   : > { %s2518_s30 = smov %s2232_s18  ;;  %27 = sbr.rel (!%p25_p7) target bundleno = 13 (0xd), region = 122 }
 0x762   :  { %1409 = vsyncpa [#allocation3], 1 }
 0x763   :  { %1411 = vsyncpa [#allocation3 + $0x1], 1 }
 0x764   :  { %1412 = vsyncpa [#allocation8], 1 }
 0x765   :  { %1413 = vsyncpa [#allocation11], 1 }
 0x766   :  { %1414 = vsyncpa [#allocation14], 1 }
 0x767   :  { %1415 = vsyncpa [#allocation4], 1 }
 0x768   :  { %1417 = vsyncpa [#allocation4 + $0x1], 1 }
 0x769   :  { %1418 = vsyncpa [#allocation5], 1 }
 0x76a   :  { %1420 = vsyncpa [#allocation5 + $0x1], 1 }

</bundles_post_ra>
